<compile_context>
chip_gen: v7x
topology: tpu7x:2x2x1
jax: 0.10.0
libtpu: 0.0.40
codegen_flags: <defaults>
</compile_context>

<pallas_src>
import functools

import jax
import jax.numpy as jnp
from jax.experimental import pallas as pl
from jax.experimental.pallas import tpu as pltpu


# ----------------------------- in-kernel helpers ----------------------------

def _layernorm(x, gamma, beta, eps=1e-5):
    # f32 throughout; matches torch.nn.LayerNorm (biased variance, eps in sqrt).
    mean = jnp.mean(x, axis=-1, keepdims=True)
    var = jnp.mean((x - mean) ** 2, axis=-1, keepdims=True)
    return (x - mean) / jnp.sqrt(var + eps) * gamma + beta


def _split_heads(t, heads, head_dim):
    # (N, heads*head_dim) -> (heads, N, head_dim): leading-batch layout so every
    # attention matmul is a canonical batched dot (no per-head lane slices).
    n = t.shape[0]
    return jnp.transpose(t.reshape(n, heads, head_dim), (1, 0, 2))


def _attention(q_f32, k3, v3, *, heads, head_dim, scale, kv_append_q, mxu_dtype):
    """Head-batched softmax attention.

    q_f32: (Nx, inner) f32 query projection.
    k3/v3: (heads, Nc, head_dim), already cast to `mxu_dtype`.
    Returns (heads, Nx, head_dim) f32.
    """
    q3 = _split_heads(q_f32, heads, head_dim)                    # (H, Nx, d) f32
    qs = (q3 * scale).astype(mxu_dtype)                          # scale folded into q once
    # scores against the context keys: (H, Nx, Nc)
    sk = jnp.einsum("hnd,hkd->hnk", qs, k3,
                    preferred_element_type=jnp.float32)
    if kv_append_q:
        # kv_append_q without materializing concat([q, k]) / concat([q, v]):
        # two score blocks share one row max / denominator; PV is two
        # accumulating matmuls (unscaled q doubles as key AND value).
        qm = q3.astype(mxu_dtype)
        sq = jnp.einsum("hnd,hmd->hnm", qs, qm,
                        preferred_element_type=jnp.float32)      # (H, Nx, Nx)
        m = jnp.maximum(jnp.max(sq, axis=-1, keepdims=True),
                        jnp.max(sk, axis=-1, keepdims=True))
        pq = jnp.exp(sq - m)                                     # softmax kept in f32
        pk = jnp.exp(sk - m)
        denom = (jnp.sum(pq, axis=-1, keepdims=True)
                 + jnp.sum(pk, axis=-1, keepdims=True))
        acc = jnp.einsum("hnm,hmd->hnd", pq.astype(mxu_dtype), qm,
                         preferred_element_type=jnp.float32)
        acc = acc + jnp.einsum("hnk,hkd->hnd", pk.astype(mxu_dtype), v3,
                               preferred_element_type=jnp.float32)
    else:
        m = jnp.max(sk, axis=-1, keepdims=True)
        pk = jnp.exp(sk - m)
        denom = jnp.sum(pk, axis=-1, keepdims=True)
        acc = jnp.einsum("hnk,hkd->hnd", pk.astype(mxu_dtype), v3,
                         preferred_element_type=jnp.float32)
    # Exact normalization (plain f32 divide): tight parity with the reference.
    return acc / denom


def _project_out(oh, wout3_m, mxu_dtype):
    # Per-head accumulation into the output projection: batched matmul over the
    # head axis followed by a head sum — no lane-dim concat of per-head outputs.
    oD = jnp.einsum("hnd,hdD->hnD", oh.astype(mxu_dtype), wout3_m,
                    preferred_element_type=jnp.float32)          # (H, Nx, Dq)
    return jnp.sum(oD, axis=0)                                   # (Nx, Dq)


# ----------------------------- kernels --------------------------------------

def _fused_c_kernel(x_ref, c_ref, g_ref, b_ref, wq_ref, wkv_ref, wout_ref,
                    o_ref, kv_ref, *, heads, head_dim, scale, kv_append_q,
                    mxu_dtype):
    # x: (1, Nx, Dq)  c: (1, Nc, Dc)  g/b: (1, Dq)
    # wq: (Dq, inner)  wkv: (Dc, 2*inner)  wout: (H, d, Dq)
    # o: (1, Nx, Dq)   kv: (1, Nc, 2*inner) lane-dense raw projection
    inner = heads * head_dim
    xn = _layernorm(x_ref[0].astype(jnp.float32), g_ref[...], b_ref[...])
    q = jnp.dot(xn.astype(mxu_dtype), wq_ref[...].astype(mxu_dtype),
                preferred_element_type=jnp.float32)              # (Nx, inner)
    kv = jnp.dot(c_ref[0].astype(mxu_dtype), wkv_ref[...].astype(mxu_dtype),
                 preferred_element_type=jnp.float32)             # (Nc, 2*inner)
    # Lane-dense cache store (no per-head 16-wide masked stores).
    # TODO(synk): keep the cache f32 even when x is bf16 if exact c/kvt parity
    #             is required.
    kv_ref[0] = kv.astype(kv_ref.dtype)
    k3 = _split_heads(kv[:, :inner], heads, head_dim).astype(mxu_dtype)
    v3 = _split_heads(kv[:, inner:], heads, head_dim).astype(mxu_dtype)
    oh = _attention(q, k3, v3, heads=heads, head_dim=head_dim, scale=scale,
                    kv_append_q=kv_append_q, mxu_dtype=mxu_dtype)
    o_ref[0] = _project_out(oh, wout_ref[...].astype(mxu_dtype),
                            mxu_dtype).astype(o_ref.dtype)


def _fused_kvt_kernel(x_ref, k_ref, v_ref, g_ref, b_ref, wq_ref, wout_ref,
                      o_ref, *, heads, head_dim, scale, kv_append_q, mxu_dtype):
    # Cached-KV path; k/v arrive lane-dense as (1, Nc, inner).
    xn = _layernorm(x_ref[0].astype(jnp.float32), g_ref[...], b_ref[...])
    q = jnp.dot(xn.astype(mxu_dtype), wq_ref[...].astype(mxu_dtype),
                preferred_element_type=jnp.float32)
    k3 = _split_heads(k_ref[0].astype(mxu_dtype), heads, head_dim)
    v3 = _split_heads(v_ref[0].astype(mxu_dtype), heads, head_dim)
    oh = _attention(q, k3, v3, heads=heads, head_dim=head_dim, scale=scale,
                    kv_append_q=kv_append_q, mxu_dtype=mxu_dtype)
    o_ref[0] = _project_out(oh, wout_ref[...].astype(mxu_dtype),
                            mxu_dtype).astype(o_ref.dtype)


# ----------------------------- module ----------------------------------------

class CrossAttentionPallas:
    def __init__(self, key, *, query_dim, context_dim, head_dim, heads,
                 kv_append_q, mxu_dtype=jnp.bfloat16):
        self.query_dim = query_dim
        self.context_dim = context_dim
        self.head_dim = head_dim
        self.heads = heads
        self.inner_dim = head_dim * heads
        self.kv_append_q = kv_append_q
        self.scale = head_dim ** -0.5
        # bf16 MXU operands by default (f32 accumulation / LayerNorm / softmax);
        # pass mxu_dtype=jnp.float32 for bit-tight parity with a full-f32 ref.
        self.mxu_dtype = mxu_dtype

        k1, k2, k3, k4, k5 = jax.random.split(key, 5)
        self.ln_gamma = (1.0 + 0.1 * jax.random.normal(k4, (1, query_dim))).astype(jnp.float32)
        self.ln_beta = (0.1 * jax.random.normal(k5, (1, query_dim))).astype(jnp.float32)
        # Linear weights, stored pre-transposed as (in, out).
        self.wq = (jax.random.normal(k1, (query_dim, self.inner_dim)) * query_dim ** -0.5).astype(jnp.float32)
        self.wkv = (jax.random.normal(k2, (context_dim, 2 * self.inner_dim)) * context_dim ** -0.5).astype(jnp.float32)
        self.wout = (jax.random.normal(k3, (self.inner_dim, query_dim)) * self.inner_dim ** -0.5).astype(jnp.float32)

    # --- advisory cost estimate ---
    def _cost(self, B, Nx, Nc, with_kv_proj):
        Dq, Dc, inner = self.query_dim, self.context_dim, self.inner_dim
        H, d = self.heads, self.head_dim
        Nk = Nx + Nc if self.kv_append_q else Nc
        flops = 2 * B * (Nx * Dq * inner
                         + (Nc * Dc * 2 * inner if with_kv_proj else 0)
                         + 2 * H * Nx * Nk * d
                         + Nx * inner * Dq)
        bytes_accessed = 4 * (B * (Nx * Dq * 2 + Nc * Dc + 2 * Nc * inner)
                              + Dq * inner + Dc * 2 * inner + inner * Dq + 2 * Dq)
        return pl.CostEstimate(flops=flops,
                               transcendentals=B * H * Nx * Nk,
                               bytes_accessed=bytes_accessed)

    # --- explicit scoped-VMEM limit, sized from the actual resident buffers ---
    def _vmem_limit(self, Nx, Nc, with_kv_proj):
        Dq, Dc, inner = self.query_dim, self.context_dim, self.inner_dim
        H = self.heads
        Nk = Nx + Nc if self.kv_append_q else Nc
        blocks = Nx * Dq + Nx * Dq + 2 * Dq + Dq * inner + inner * Dq
        if with_kv_proj:
            blocks += Nc * Dc + Dc * 2 * inner + Nc * 2 * inner
        else:
            blocks += 2 * Nc * inner
        scratch = 6 * (Nx + Nc) * inner + 2 * H * Nx * Nk
        est_bytes = 4 * (2 * blocks + scratch)          # x2: double-buffered pipeline
        return int(min(max(2 * est_bytes, 16 * 1024 * 1024), 96 * 1024 * 1024))

    def __call__(self, x, c=None, kvt=None, attn_mask=None):
        # TODO(synk): attn_mask not implemented (additive bias before row-max).
        assert attn_mask is None
        B, Nx, Dq = x.shape
        H, d, inner = self.heads, self.head_dim, self.inner_dim
        wout3 = self.wout.reshape(H, d, Dq)

        if c is not None and kvt is None:
            Bc, Nc, Dc = c.shape
            assert Bc == B
            kernel = functools.partial(
                _fused_c_kernel, heads=H, head_dim=d, scale=self.scale,
                kv_append_q=self.kv_append_q, mxu_dtype=self.mxu_dtype)
            o, kv_raw = pl.pallas_call(
                kernel,
                out_shape=(
                    jax.ShapeDtypeStruct((B, Nx, Dq), x.dtype),
                    jax.ShapeDtypeStruct((B, Nc, 2 * inner), x.dtype),
                ),
                grid=(B,),
                in_specs=[
                    pl.BlockSpec((1, Nx, Dq), lambda b: (b, 0, 0)),
                    pl.BlockSpec((1, Nc, Dc), lambda b: (b, 0, 0)),
                    pl.BlockSpec((1, Dq), lambda b: (0, 0)),
                    pl.BlockSpec((1, Dq), lambda b: (0, 0)),
                    pl.BlockSpec((Dq, inner), lambda b: (0, 0)),
                    pl.BlockSpec((Dc, 2 * inner), lambda b: (0, 0)),
                    pl.BlockSpec((H, d, Dq), lambda b: (0, 0, 0)),
                ],
                out_specs=(
                    pl.BlockSpec((1, Nx, Dq), lambda b: (b, 0, 0)),
                    pl.BlockSpec((1, Nc, 2 * inner), lambda b: (b, 0, 0)),
                ),
                compiler_params=pltpu.CompilerParams(
                    dimension_semantics=("parallel",),
                    vmem_limit_bytes=self._vmem_limit(Nx, Nc, True)),
                cost_estimate=self._cost(B, Nx, Nc, with_kv_proj=True),
            )(x, c, self.ln_gamma, self.ln_beta, self.wq, self.wkv, wout3)
            # Wrapper-side layout plumbing: lane-dense cache -> PyTorch
            # (B, H, Nc, d) k/v layout expected by the module contract.
            kv5 = kv_raw.reshape(B, Nc, 2, H, d)
            k = jnp.transpose(kv5[:, :, 0], (0, 2, 1, 3))
            v = jnp.transpose(kv5[:, :, 1], (0, 2, 1, 3))
            kvt = (k, v)

        elif kvt is not None and c is None:
            k_in, v_in = kvt
            Bc, Hh, Nc, dd = k_in.shape
            assert (Bc, Hh, dd) == (B, H, d)
            # Convert the cache to a lane-dense (B, Nc, inner) slab for the kernel.
            k_dense = jnp.transpose(k_in, (0, 2, 1, 3)).reshape(B, Nc, inner)
            v_dense = jnp.transpose(v_in, (0, 2, 1, 3)).reshape(B, Nc, inner)
            kernel = functools.partial(
                _fused_kvt_kernel, heads=H, head_dim=d, scale=self.scale,
                kv_append_q=self.kv_append_q, mxu_dtype=self.mxu_dtype)
            o = pl.pallas_call(
                kernel,
                out_shape=jax.ShapeDtypeStruct((B, Nx, Dq), x.dtype),
                grid=(B,),
                in_specs=[
                    pl.BlockSpec((1, Nx, Dq), lambda b: (b, 0, 0)),
                    pl.BlockSpec((1, Nc, inner), lambda b: (b, 0, 0)),
                    pl.BlockSpec((1, Nc, inner), lambda b: (b, 0, 0)),
                    pl.BlockSpec((1, Dq), lambda b: (0, 0)),
                    pl.BlockSpec((1, Dq), lambda b: (0, 0)),
                    pl.BlockSpec((Dq, inner), lambda b: (0, 0)),
                    pl.BlockSpec((H, d, Dq), lambda b: (0, 0, 0)),
                ],
                out_specs=pl.BlockSpec((1, Nx, Dq), lambda b: (b, 0, 0)),
                compiler_params=pltpu.CompilerParams(
                    dimension_semantics=("parallel",),
                    vmem_limit_bytes=self._vmem_limit(Nx, Nc, False)),
                cost_estimate=self._cost(B, Nx, Nc, with_kv_proj=False),
            )(x, k_dense, v_dense, self.ln_gamma, self.ln_beta, self.wq, wout3)
        else:
            raise ValueError("XOR(c, kvt) violated.")

        return o, kvt


# ----------------------------- reference + main -------------------------------

def _reference(mod, x, c=None, kvt=None):
    # Pure f32 JAX reference mirroring the PyTorch forward exactly.
    B, Nx, _ = x.shape
    mean = jnp.mean(x, axis=-1, keepdims=True)
    var = jnp.mean((x - mean) ** 2, axis=-1, keepdims=True)
    xn = (x - mean) / jnp.sqrt(var + 1e-5) * mod.ln_gamma[0] + mod.ln_beta[0]
    q = (xn @ mod.wq).reshape(B, Nx, mod.heads, mod.head_dim).transpose(0, 2, 1, 3)
    if c is not None:
        Bc, Nc, _ = c.shape
        kv = (c @ mod.wkv).reshape(Bc, Nc, 2, mod.heads, mod.head_dim).transpose(2, 0, 3, 1, 4)
        k, v = kv[0], kv[1]
        kvt = (k, v)
    else:
        k, v = kvt
    if mod.kv_append_q:
        k = jnp.concatenate([q, k], axis=-2)
        v = jnp.concatenate([q, v], axis=-2)
    s = jnp.einsum("bhqd,bhkd->bhqk", q, k) * mod.scale
    p = jax.nn.softmax(s, axis=-1)
    a = jnp.einsum("bhqk,bhkd->bhqd", p, v)
    a = a.transpose(0, 2, 1, 3).reshape(B, Nx, mod.inner_dim)
    return a @ mod.wout, kvt


if __name__ == "__main__":
    key = jax.random.PRNGKey(0)
    k_mod, k_x, k_c = jax.random.split(key, 3)

    B, Nx, Nc = 2, 8, 16
    query_dim, context_dim, head_dim, heads = 32, 24, 16, 2

    x = jax.random.normal(k_x, (B, Nx, query_dim), dtype=jnp.float32)
    c = jax.random.normal(k_c, (B, Nc, context_dim), dtype=jnp.float32)

    # ---- exact-parity configuration (f32 MXU operands) ----
    mod_f32 = CrossAttentionPallas(
        k_mod, query_dim=query_dim, context_dim=context_dim,
        head_dim=head_dim, heads=heads, kv_append_q=True,
        mxu_dtype=jnp.float32)

    o, (k_out, v_out) = mod_f32(x, c=c)
    jax.block_until_ready(o)
    jax.block_until_ready(k_out)
    jax.block_until_ready(v_out)

    o_ref, (k_ref_, v_ref_) = _reference(mod_f32, x, c=c)
    assert o.shape == (B, Nx, query_dim)
    assert k_out.shape == (B, heads, Nc, head_dim)
    assert v_out.shape == (B, heads, Nc, head_dim)
    assert jnp.allclose(k_out, k_ref_, atol=1e-4, rtol=1e-4)
    assert jnp.allclose(v_out, v_ref_, atol=1e-4, rtol=1e-4)
    assert jnp.allclose(o, o_ref, atol=1e-3, rtol=1e-3)      # exact softmax divide

    o2, _ = mod_f32(x, kvt=(k_out, v_out))
    o2 = jax.block_until_ready(o2)
    assert jnp.allclose(o2, o_ref, atol=1e-3, rtol=1e-3)

    # ---- default configuration (bf16 MXU operands, f32 accumulation) ----
    mod = CrossAttentionPallas(
        k_mod, query_dim=query_dim, context_dim=context_dim,
        head_dim=head_dim, heads=heads, kv_append_q=True)

    ob, kvt_b = mod(x, c=c)
    jax.block_until_ready(ob)
    assert jnp.allclose(ob, o_ref, atol=1e-1, rtol=1e-1)     # bf16 operand rounding

    ob2, _ = mod(x, kvt=kvt_b)
    jax.block_until_ready(ob2)
    assert jnp.allclose(ob2, o_ref, atol=1e-1, rtol=1e-1)

    print("KERNEL_OK")
</pallas_src>

<mosaic_0001>
module attributes {stable_mosaic.version = 11 : i64} {
  func.func @_fused_c_kernel(%arg0: i32, %arg1: memref<1x8x32xf32, #tpu.memory_space<vmem>>, %arg2: memref<1x16x24xf32, #tpu.memory_space<vmem>>, %arg3: memref<1x32xf32, #tpu.memory_space<vmem>>, %arg4: memref<1x32xf32, #tpu.memory_space<vmem>>, %arg5: memref<32x32xf32, #tpu.memory_space<vmem>>, %arg6: memref<24x64xf32, #tpu.memory_space<vmem>>, %arg7: memref<2x16x32xf32, #tpu.memory_space<vmem>>, %arg8: memref<1x8x32xf32, #tpu.memory_space<vmem>>, %arg9: memref<1x16x64xf32, #tpu.memory_space<vmem>>) attributes {dimension_semantics = [#tpu.dimension_semantics<parallel>], iteration_bounds = array<i64: 2>, scalar_prefetch = 0 : i64, scratch_operands = 0 : i64, tpu.core_type = #tpu.core_type<tc>, window_params = [{transform_indices = @transform_0, window_bounds = array<i64: 1, 8, 32>}, {transform_indices = @transform_1, window_bounds = array<i64: 1, 16, 24>}, {pipeline_mode = #tpu.pipeline_mode<synchronous>, transform_indices = @transform_2, window_bounds = array<i64: 1, 32>}, {pipeline_mode = #tpu.pipeline_mode<synchronous>, transform_indices = @transform_3, window_bounds = array<i64: 1, 32>}, {pipeline_mode = #tpu.pipeline_mode<synchronous>, transform_indices = @transform_4, window_bounds = array<i64: 32, 32>}, {pipeline_mode = #tpu.pipeline_mode<synchronous>, transform_indices = @transform_5, window_bounds = array<i64: 24, 64>}, {pipeline_mode = #tpu.pipeline_mode<synchronous>, transform_indices = @transform_6, window_bounds = array<i64: 2, 16, 32>}, {transform_indices = @transform_7, window_bounds = array<i64: 1, 8, 32>}, {transform_indices = @transform_8, window_bounds = array<i64: 1, 16, 64>}]} {
    %c0 = arith.constant 0 : index
    %c0_0 = arith.constant 0 : index
    %c0_1 = arith.constant 0 : index
    %0 = vector.load %arg1[%c0, %c0_0, %c0_1] : memref<1x8x32xf32, #tpu.memory_space<vmem>>, vector<1x8x32xf32>
    %1 = vector.shape_cast %0 : vector<1x8x32xf32> to vector<8x32xf32>
    %c0_2 = arith.constant 0 : index
    %c0_3 = arith.constant 0 : index
    %2 = vector.load %arg3[%c0_2, %c0_3] : memref<1x32xf32, #tpu.memory_space<vmem>>, vector<1x32xf32>
    %c0_4 = arith.constant 0 : index
    %c0_5 = arith.constant 0 : index
    %3 = vector.load %arg4[%c0_4, %c0_5] : memref<1x32xf32, #tpu.memory_space<vmem>>, vector<1x32xf32>
    %cst = arith.constant dense<0.000000e+00> : vector<8xf32>
    %4 = vector.multi_reduction <add>, %1, %cst [1] : vector<8x32xf32> to vector<8xf32>
    %5 = vector.shape_cast %4 : vector<8xf32> to vector<8x1xf32>
    %cst_6 = arith.constant 3.200000e+01 : f32
    %6 = vector.broadcast %cst_6 : f32 to vector<8x1xf32>
    %7 = arith.divf %5, %6 : vector<8x1xf32>
    %8 = vector.broadcast %7 : vector<8x1xf32> to vector<8x32xf32>
    %9 = arith.subf %1, %8 : vector<8x32xf32>
    %10 = arith.mulf %9, %9 : vector<8x32xf32>
    %cst_7 = arith.constant dense<0.000000e+00> : vector<8xf32>
    %11 = vector.multi_reduction <add>, %10, %cst_7 [1] : vector<8x32xf32> to vector<8xf32>
    %12 = vector.shape_cast %11 : vector<8xf32> to vector<8x1xf32>
    %cst_8 = arith.constant 3.200000e+01 : f32
    %13 = vector.broadcast %cst_8 : f32 to vector<8x1xf32>
    %14 = arith.divf %12, %13 : vector<8x1xf32>
    %15 = vector.broadcast %7 : vector<8x1xf32> to vector<8x32xf32>
    %16 = arith.subf %1, %15 : vector<8x32xf32>
    %cst_9 = arith.constant 9.99999974E-6 : f32
    %17 = vector.broadcast %cst_9 : f32 to vector<8x1xf32>
    %18 = arith.addf %14, %17 : vector<8x1xf32>
    %19 = math.sqrt %18 : vector<8x1xf32>
    %20 = vector.broadcast %19 : vector<8x1xf32> to vector<8x32xf32>
    %21 = arith.divf %16, %20 : vector<8x32xf32>
    %22 = vector.broadcast %2 : vector<1x32xf32> to vector<8x32xf32>
    %23 = arith.mulf %21, %22 : vector<8x32xf32>
    %24 = vector.broadcast %3 : vector<1x32xf32> to vector<8x32xf32>
    %25 = arith.addf %23, %24 : vector<8x32xf32>
    %c0_10 = arith.constant 0 : index
    %c0_11 = arith.constant 0 : index
    %26 = vector.load %arg5[%c0_10, %c0_11] : memref<32x32xf32, #tpu.memory_space<vmem>>, vector<32x32xf32>
    %cst_12 = arith.constant dense<0.000000e+00> : vector<8x32xf32>
    %27 = tpu.matmul %25, %26, %cst_12 {dimension_numbers = #tpu.dot_dimension_numbers<[1], [0], [0], [1], [0, 0, 1, 1], [], []>} : vector<8x32xf32>, vector<32x32xf32>, vector<8x32xf32> -> vector<8x32xf32>
    %c0_13 = arith.constant 0 : index
    %c0_14 = arith.constant 0 : index
    %c0_15 = arith.constant 0 : index
    %28 = vector.load %arg2[%c0_13, %c0_14, %c0_15] : memref<1x16x24xf32, #tpu.memory_space<vmem>>, vector<1x16x24xf32>
    %29 = vector.shape_cast %28 : vector<1x16x24xf32> to vector<16x24xf32>
    %c0_16 = arith.constant 0 : index
    %c0_17 = arith.constant 0 : index
    %30 = vector.load %arg6[%c0_16, %c0_17] : memref<24x64xf32, #tpu.memory_space<vmem>>, vector<24x64xf32>
    %cst_18 = arith.constant dense<0.000000e+00> : vector<16x64xf32>
    %31 = tpu.matmul %29, %30, %cst_18 {dimension_numbers = #tpu.dot_dimension_numbers<[1], [0], [0], [1], [0, 0, 1, 1], [], []>} : vector<16x24xf32>, vector<24x64xf32>, vector<16x64xf32> -> vector<16x64xf32>
    %c0_19 = arith.constant 0 : index
    %c0_20 = arith.constant 0 : index
    %c0_21 = arith.constant 0 : index
    %32 = vector.load %arg9[%c0_19, %c0_20, %c0_21] : memref<1x16x64xf32, #tpu.memory_space<vmem>>, vector<1x16x64xf32>
    %33 = vector.shape_cast %32 : vector<1x16x64xf32> to vector<16x64xf32>
    %34 = vector.shape_cast %31 : vector<16x64xf32> to vector<1x16x64xf32>
    tpu.vector_store %arg9[%c0_19, %c0_20, %c0_21], %34 {strides = array<i32>} : memref<1x16x64xf32, #tpu.memory_space<vmem>>, vector<1x16x64xf32>,
    %35 = vector.extract_strided_slice %31 {offsets = [0, 0], sizes = [16, 32], strides = [1, 1]} : vector<16x64xf32> to vector<16x32xf32>
    %36 = vector.shape_cast %35 : vector<16x32xf32> to vector<16x2x16xf32>
    %37 = tpu.transpose %36, [1, 0, 2] : vector<16x2x16xf32> -> vector<2x16x16xf32>
    %38 = vector.extract_strided_slice %31 {offsets = [0, 32], sizes = [16, 32], strides = [1, 1]} : vector<16x64xf32> to vector<16x32xf32>
    %39 = vector.shape_cast %38 : vector<16x32xf32> to vector<16x2x16xf32>
    %40 = tpu.transpose %39, [1, 0, 2] : vector<16x2x16xf32> -> vector<2x16x16xf32>
    %41 = vector.shape_cast %27 : vector<8x32xf32> to vector<8x2x16xf32>
    %42 = tpu.transpose %41, [1, 0, 2] : vector<8x2x16xf32> -> vector<2x8x16xf32>
    %cst_22 = arith.constant 2.500000e-01 : f32
    %43 = vector.broadcast %cst_22 : f32 to vector<2x8x16xf32>
    %44 = arith.mulf %42, %43 : vector<2x8x16xf32>
    "tpu.trace_start"() <{level = 10 : i32, message = "hnd,hkd->hnk"}> : () -> ()
    %cst_23 = arith.constant dense<0.000000e+00> : vector<2x8x16xf32>
    %45 = tpu.matmul %44, %37, %cst_23 {dimension_numbers = #tpu.dot_dimension_numbers<[2], [2], [1], [1], [0, 0, 0, 1, 1, 1], [0], [0]>} : vector<2x8x16xf32>, vector<2x16x16xf32>, vector<2x8x16xf32> -> vector<2x8x16xf32>
    "tpu.trace_stop"() : () -> ()
    "tpu.trace_start"() <{level = 10 : i32, message = "hnd,hmd->hnm"}> : () -> ()
    %cst_24 = arith.constant dense<0.000000e+00> : vector<2x8x8xf32>
    %46 = tpu.matmul %44, %42, %cst_24 {dimension_numbers = #tpu.dot_dimension_numbers<[2], [2], [1], [1], [0, 0, 0, 1, 1, 1], [0], [0]>} : vector<2x8x16xf32>, vector<2x8x16xf32>, vector<2x8x8xf32> -> vector<2x8x8xf32>
    "tpu.trace_stop"() : () -> ()
    %cst_25 = arith.constant dense<0xFF800000> : vector<2x8xf32>
    %47 = vector.multi_reduction <maximumf>, %46, %cst_25 [2] : vector<2x8x8xf32> to vector<2x8xf32>
    %48 = vector.shape_cast %47 : vector<2x8xf32> to vector<2x8x1xf32>
    %cst_26 = arith.constant dense<0xFF800000> : vector<2x8xf32>
    %49 = vector.multi_reduction <maximumf>, %45, %cst_26 [2] : vector<2x8x16xf32> to vector<2x8xf32>
    %50 = vector.shape_cast %49 : vector<2x8xf32> to vector<2x8x1xf32>
    %51 = arith.maximumf %48, %50 : vector<2x8x1xf32>
    %52 = vector.broadcast %51 : vector<2x8x1xf32> to vector<2x8x8xf32>
    %53 = arith.subf %46, %52 : vector<2x8x8xf32>
    %54 = math.exp %53 : vector<2x8x8xf32>
    %55 = vector.broadcast %51 : vector<2x8x1xf32> to vector<2x8x16xf32>
    %56 = arith.subf %45, %55 : vector<2x8x16xf32>
    %57 = math.exp %56 : vector<2x8x16xf32>
    %cst_27 = arith.constant dense<0.000000e+00> : vector<2x8xf32>
    %58 = vector.multi_reduction <add>, %54, %cst_27 [2] : vector<2x8x8xf32> to vector<2x8xf32>
    %59 = vector.shape_cast %58 : vector<2x8xf32> to vector<2x8x1xf32>
    %cst_28 = arith.constant dense<0.000000e+00> : vector<2x8xf32>
    %60 = vector.multi_reduction <add>, %57, %cst_28 [2] : vector<2x8x16xf32> to vector<2x8xf32>
    %61 = vector.shape_cast %60 : vector<2x8xf32> to vector<2x8x1xf32>
    %62 = arith.addf %59, %61 : vector<2x8x1xf32>
    "tpu.trace_start"() <{level = 10 : i32, message = "hnm,hmd->hnd"}> : () -> ()
    %cst_29 = arith.constant dense<0.000000e+00> : vector<2x8x16xf32>
    %63 = tpu.matmul %54, %42, %cst_29 {dimension_numbers = #tpu.dot_dimension_numbers<[2], [1], [1], [2], [0, 0, 0, 1, 1, 2], [0], [0]>} : vector<2x8x8xf32>, vector<2x8x16xf32>, vector<2x8x16xf32> -> vector<2x8x16xf32>
    "tpu.trace_stop"() : () -> ()
    "tpu.trace_start"() <{level = 10 : i32, message = "hnk,hkd->hnd"}> : () -> ()
    %cst_30 = arith.constant dense<0.000000e+00> : vector<2x8x16xf32>
    %64 = tpu.matmul %57, %40, %cst_30 {dimension_numbers = #tpu.dot_dimension_numbers<[2], [1], [1], [2], [0, 0, 0, 1, 1, 2], [0], [0]>} : vector<2x8x16xf32>, vector<2x16x16xf32>, vector<2x8x16xf32> -> vector<2x8x16xf32>
    "tpu.trace_stop"() : () -> ()
    %65 = arith.addf %63, %64 : vector<2x8x16xf32>
    %66 = vector.broadcast %62 : vector<2x8x1xf32> to vector<2x8x16xf32>
    %67 = arith.divf %65, %66 : vector<2x8x16xf32>
    %c0_31 = arith.constant 0 : index
    %c0_32 = arith.constant 0 : index
    %c0_33 = arith.constant 0 : index
    %68 = vector.load %arg7[%c0_31, %c0_32, %c0_33] : memref<2x16x32xf32, #tpu.memory_space<vmem>>, vector<2x16x32xf32>
    "tpu.trace_start"() <{level = 10 : i32, message = "hnd,hdD->hnD"}> : () -> ()
    %cst_34 = arith.constant dense<0.000000e+00> : vector<2x8x32xf32>
    %69 = tpu.matmul %67, %68, %cst_34 {dimension_numbers = #tpu.dot_dimension_numbers<[2], [1], [1], [2], [0, 0, 0, 1, 1, 2], [0], [0]>} : vector<2x8x16xf32>, vector<2x16x32xf32>, vector<2x8x32xf32> -> vector<2x8x32xf32>
    "tpu.trace_stop"() : () -> ()
    %cst_35 = arith.constant dense<0.000000e+00> : vector<8x32xf32>
    %70 = vector.multi_reduction <add>, %69, %cst_35 [0] : vector<2x8x32xf32> to vector<8x32xf32>
    %c0_36 = arith.constant 0 : index
    %c0_37 = arith.constant 0 : index
    %c0_38 = arith.constant 0 : index
    %71 = vector.load %arg8[%c0_36, %c0_37, %c0_38] : memref<1x8x32xf32, #tpu.memory_space<vmem>>, vector<1x8x32xf32>
    %72 = vector.shape_cast %71 : vector<1x8x32xf32> to vector<8x32xf32>
    %73 = vector.shape_cast %70 : vector<8x32xf32> to vector<1x8x32xf32>
    tpu.vector_store %arg8[%c0_36, %c0_37, %c0_38], %73 {strides = array<i32>} : memref<1x8x32xf32, #tpu.memory_space<vmem>>, vector<1x8x32xf32>,
    return
  }
  func.func @transform_0(%arg0: i32) -> (i32, i32, i32) {
    %c0_i32 = arith.constant 0 : i32
    %c0_i32_0 = arith.constant 0 : i32
    %c0_i32_1 = arith.constant 0 : i32
    return %arg0, %c0_i32, %c0_i32_0 : i32, i32, i32
  }
  func.func @transform_1(%arg0: i32) -> (i32, i32, i32) {
    %c0_i32 = arith.constant 0 : i32
    %c0_i32_0 = arith.constant 0 : i32
    %c0_i32_1 = arith.constant 0 : i32
    return %arg0, %c0_i32, %c0_i32_0 : i32, i32, i32
  }
  func.func @transform_2(%arg0: i32) -> (i32, i32) {
    %c0_i32 = arith.constant 0 : i32
    %c0_i32_0 = arith.constant 0 : i32
    %c0_i32_1 = arith.constant 0 : i32
    return %c0_i32, %c0_i32_0 : i32, i32
  }
  func.func @transform_3(%arg0: i32) -> (i32, i32) {
    %c0_i32 = arith.constant 0 : i32
    %c0_i32_0 = arith.constant 0 : i32
    %c0_i32_1 = arith.constant 0 : i32
    return %c0_i32, %c0_i32_0 : i32, i32
  }
  func.func @transform_4(%arg0: i32) -> (i32, i32) {
    %c0_i32 = arith.constant 0 : i32
    %c0_i32_0 = arith.constant 0 : i32
    %c0_i32_1 = arith.constant 0 : i32
    return %c0_i32, %c0_i32_0 : i32, i32
  }
  func.func @transform_5(%arg0: i32) -> (i32, i32) {
    %c0_i32 = arith.constant 0 : i32
    %c0_i32_0 = arith.constant 0 : i32
    %c0_i32_1 = arith.constant 0 : i32
    return %c0_i32, %c0_i32_0 : i32, i32
  }
  func.func @transform_6(%arg0: i32) -> (i32, i32, i32) {
    %c0_i32 = arith.constant 0 : i32
    %c0_i32_0 = arith.constant 0 : i32
    %c0_i32_1 = arith.constant 0 : i32
    %c0_i32_2 = arith.constant 0 : i32
    return %c0_i32, %c0_i32_0, %c0_i32_1 : i32, i32, i32
  }
  func.func @transform_7(%arg0: i32) -> (i32, i32, i32) {
    %c0_i32 = arith.constant 0 : i32
    %c0_i32_0 = arith.constant 0 : i32
    %c0_i32_1 = arith.constant 0 : i32
    return %arg0, %c0_i32, %c0_i32_0 : i32, i32, i32
  }
  func.func @transform_8(%arg0: i32) -> (i32, i32, i32) {
    %c0_i32 = arith.constant 0 : i32
    %c0_i32_0 = arith.constant 0 : i32
    %c0_i32_1 = arith.constant 0 : i32
    return %arg0, %c0_i32, %c0_i32_0 : i32, i32, i32
  }
}

</mosaic_0001>

<bundles_post_ra>
// kernel: tpu_custom_call.1
= control target key start
LH: loop header
LB: loop body
LE: loop exit
PB: predicated region body
PF: predicated region fallthrough
CT: control target
= control target key end

     0   :  { %s3400_s0 = inlined_call_operand.hbm [shape: f32[2,8,32], index: 0, kind: input, shape index: {}]   ;;  %s3401_s1 = inlined_call_operand.hbm [shape: f32[2,16,24], index: 1, kind: input, shape index: {}]   ;;  %s3402_s2 = inlined_call_operand.vmem [shape: f32[1,32], index: 2, kind: input, shape index: {}]   ;;  %s3403_s3 = inlined_call_operand.vmem [shape: f32[1,32], index: 3, kind: input, shape index: {}]   ;;  %s3404_s4 = inlined_call_operand.hbm [shape: f32[32,32], index: 4, kind: input, shape index: {}]   ;;  %s3405_s5 = inlined_call_operand.hbm [shape: f32[24,64], index: 5, kind: input, shape index: {}]   ;;  %s3406_s6 = inlined_call_operand.hbm [shape: f32[2,16,32], index: 6, kind: input, shape index: {}]   ;;  %s3407_s7 = inlined_call_operand.hbm [shape: f32[2,8,32], index: 7, kind: output, shape index: {0}]   ;;  %s3408_s8 = inlined_call_operand.hbm [shape: f32[2,16,64], index: 8, kind: output, shape index: {1}]  }
   0x1   :  { %3416 = sst [smem:[#allocation22_spill]] %s3400_s0 }
   0x2   :  { %3417 = sst [smem:[#allocation23_spill]] %s3404_s4 }
   0x3   :  { %14 = vsyncpa [#allocation3], 0 }
   0x4   :  { %16 = vsyncpa [#allocation3 + $0x1], 0 }
   0x5   :  { %17 = vsyncpa [#allocation6], 0 }
   0x6   :  { %19 = vsyncpa [#allocation6 + $0x1], 0 }
   0x7   :  { %20 = vsyncpa [#allocation9], 0 }
   0x8   :  { %21 = vsyncpa [#allocation4], 0 }
   0x9   :  { %23 = vsyncpa [#allocation4 + $0x1], 0 }
   0xa   :  { %24 = vsyncpa [#allocation13], 0 }
   0xb   :  { %26 = vsyncpa [#allocation13 + $0x1], 0  ;;  %s2855_s27 = smov 0   ;;  %s2857_s28 = smov 0  }
   0xc   :  { %s2859_s29 = smov 0   ;;  %s2861_s30 = smov 0  }
   0xd LB: > { %3418 = sst [smem:[#allocation20_spill]] %s2778_s27  ;;  %s2876_s9 = sadd.s32 4294967295, %s2790_s30   ;;  %s2790_s30 = sphi %s2861_s30, %s3445_s30   ;;  %s2786_s29 = sphi %s2859_s29, %s3444_s29   ;;  %s2782_s28 = sphi %s2857_s28, %s3443_s28   ;;  %s2778_s27 = sphi %s2855_s27, %s3442_s27  }
   0xe   : > { %s2211_s10 = sadd.s32 4294967294, %s2790_s30   ;;  %p52_p0 = scmp.ne.s32.totalorder %s2782_s28, %s2778_s27 }
   0xf   : > { %p3409_p1 = scmp.eq.s32.totalorder %s2876_s9, 0  ;;  %p213_p3 = scmp.eq.s32.totalorder %s2211_s10, 1 }
  0x10   : > { %p2212_p5 = scmp.ge.s32.totalorder %s2790_s30, 1  ;;  %p246_p7 = scmp.lt.s32.totalorder %s2790_s30, 3 }
  0x11   : > { %p2885_p4 = por %p3409_p1, %p52_p0  ;;  %p2890_p6 = por %p213_p3, %p52_p0 }
  0x12   : > { %p2895_p8 = pnand %p2212_p5, %p246_p7  ;;  %s2792_s14 = smov [#allocation7]  }
  0x13   : > { %s3419_s11 = scalar_select %p2885_p4, 1, 0 }
  0x14   : > { %s3420_s12 = scalar_select %p2890_p6, 1, 0 }
  0x15   : > { %s3422_s13 = scalar_select %p2895_p8, 1, 0 }
  0x16   : > { %3421 = sst [smem:[#allocation21_spill]] %s3420_s12  ;;  %s264_s15 = sshll.u32 %s2792_s14, 4  ;;  %s2899_s15 = int_to_ptr.vmem [resolvable:$true] %s264_s15 }
  0x17   : > { %p2442_p9 = pneg %p2895_p8  ;;  %s2793_s17 = smov [#allocation8]  }
  0x18   : > { %s277_s18 = sshll.u32 %s2793_s17, 4  ;;  %s2794_s19 = smov [#allocation10]   ;;  %s2910_s18 = int_to_ptr.vmem [resolvable:$true] %s277_s18 }
  0x19   : > { %p2906_p11 = pnand %p2442_p9, %p3409_p1  ;;  %s2912_s20 = sshll.u32 %s2794_s19, 4  ;;  %s291_s20 = int_to_ptr.vmem [resolvable:$true] %s2912_s20 }
  0x1a   : > { %s3424_s4 = sld [smem:[#allocation23_spill]] }
  0x1b   : > { %p2922_p13 = pneg %p2906_p11 }
  0x20   : > { %s2536_s23 = scalar_lea.hbm %s3424_s4, 512 }
  0x21   : > { %p2537_p12 = scmp.ne.s32.totalorder %s3424_s4, %s2536_s23  ;;  %p2543_p5 = scmp.lt.u32.totalorder %s2536_s23, %s3424_s4 }
  0x23   : > { %p2539_p0 = pnand %p2922_p13, %p2537_p12 }
  0x25   : > { %p2540_p3 = pneg %p2539_p0 }
  0x27   : > { %p2545_p7 = pnand %p2543_p5, %p2540_p3 }
  0x29   : > { %2548 = shalt.err (!%p2545_p7)
}
  0x2a   : > { %s2549_s17 = scalar_lea.vmem %s2899_s15, 512  ;;  %p2557_p2 = scmp.lt.s32.totalorder %s2899_s15, %s2899_s15 }
  0x2b   : > { %p2550_p9 = scmp.ne.s32.totalorder %s2899_s15, %s2549_s17  ;;  %p2558_p6 = scmp.lt.s32.totalorder %s2549_s17, %s2549_s17 }
  0x2d   : > { %p2552_p10 = pnand %p2550_p9, %p2922_p13  ;;  %p2559_p12 = por %p2558_p6, %p2557_p2 }
  0x2f   : > { %p2553_p1 = pneg %p2552_p10 }
  0x31   : > { %p2560_p0 = pnand %p2559_p12, %p2553_p1 }
  0x33   : > { %2563 = shalt.err (!%p2560_p0)
}
  0x34   : > { %s3414_s19 = smov 128   ;;  %s3415_s21 = smov 8  }
  0x35   : > { %2445 = dma.hbm_to_vmem [thread:$0]  (!%p2906_p11), %s3424_s4, 512, %s2899_s15, [#allocation6], %s3414_s19, %s3414_s19, %s3415_s21  }
  0x36   : > { %s2564_s10 = scalar_lea.hbm %s3405_s5, 384 }
  0x37   : > { %p2565_p1 = scmp.ne.s32.totalorder %s3405_s5, %s2564_s10  ;;  %p2571_p10 = scmp.lt.u32.totalorder %s2564_s10, %s3405_s5 }
  0x39   : > { %p2567_p2 = pnand %p2565_p1, %p2922_p13 }
  0x3b   : > { %p2568_p6 = pneg %p2567_p2 }
  0x3d   : > { %p2573_p3 = pnand %p2571_p10, %p2568_p6 }
  0x3f   : > { %2576 = shalt.err (!%p2573_p3)
}
  0x40   : > { %s2577_s15 = scalar_lea.vmem %s2910_s18, 384  ;;  %p2585_p12 = scmp.lt.s32.totalorder %s2910_s18, %s2910_s18 }
  0x41   : > { %p2578_p5 = scmp.ne.s32.totalorder %s2910_s18, %s2577_s15  ;;  %p2586_p0 = scmp.lt.s32.totalorder %s2577_s15, %s2577_s15 }
  0x43   : > { %p2580_p7 = pnand %p2578_p5, %p2922_p13  ;;  %p2587_p1 = por %p2586_p0, %p2585_p12 }
  0x45   : > { %p2581_p9 = pneg %p2580_p7 }
  0x47   : > { %p2588_p2 = pnand %p2587_p1, %p2581_p9 }
  0x49   : > { %2591 = shalt.err (!%p2588_p2)
}
  0x4a   : > { %2448 = dma.hbm_to_vmem [thread:$0]  (!%p2906_p11), %s3405_s5, 384, %s2910_s18, [#allocation9], %s3414_s19, %s3414_s19, %s3415_s21  }
  0x4b   : > { %s2592_s24 = scalar_lea.hbm %s3406_s6, 512 }
  0x4c   : > { %p2593_p6 = scmp.ne.s32.totalorder %s3406_s6, %s2592_s24  ;;  %p2599_p5 = scmp.lt.u32.totalorder %s2592_s24, %s3406_s6 }
  0x4e   : > { %p2595_p10 = pnand %p2593_p6, %p2922_p13 }
  0x50   : > { %p2596_p3 = pneg %p2595_p10 }
  0x52   : > { %p2601_p7 = pnand %p2599_p5, %p2596_p3 }
  0x54   : > { %2604 = shalt.err (!%p2601_p7)
}
  0x55   : > { %s2605_s15 = scalar_lea.vmem %s291_s20, 512  ;;  %p2613_p1 = scmp.lt.s32.totalorder %s291_s20, %s291_s20 }
  0x56   : > { %p2606_p9 = scmp.ne.s32.totalorder %s291_s20, %s2605_s15  ;;  %p2614_p2 = scmp.lt.s32.totalorder %s2605_s15, %s2605_s15 }
  0x58   : > { %p2608_p12 = pnand %p2606_p9, %p2922_p13  ;;  %p2615_p4 = por %p2614_p2, %p2613_p1 }
  0x5a   : > { %p2609_p0 = pneg %p2608_p12 }
  0x5c   : > { %p2616_p8 = pnand %p2615_p4, %p2609_p0 }
  0x5e   : > { %2619 = shalt.err (!%p2616_p8)
}
  0x5f   : > { %2451 = dma.hbm_to_vmem [thread:$0]  (!%p2906_p11), %s3406_s6, 512, %s291_s20, [#allocation9], %s3414_s19, %s3414_s19, %s3415_s21  }
  0x60   : > { %s2995_s26 = sadd.s32 1, %s2790_s30   ;;  %s39_s12 = sadd.s32 1, %s2786_s29 }
  0x61   : > { %s36_s16 = ssub.s32 %s2790_s30, %s2995_s26  ;;  %p46_p8 = scmp.ne.s32.totalorder %s2786_s29, %s2782_s28 }
  0x62   : > { %p37_p4 = scmp.eq.s32.totalorder %s36_s16, 0  ;;  %p47_p13 = scmp.eq.s32.totalorder %s2790_s30, 0 }
  0x63   : > { %p2469_p6 = scmp.lt.s32.totalorder %s2790_s30, 2  ;;  %p3426_p3 = scmp.eq.s32.totalorder %s2876_s9, 1 }
  0x64   : > { %s3005_s22 = scalar_select %p37_p4, %s2786_s29, %s39_s12  }
  0x65   : > { %p48_p10 = por %p47_p13, %p46_p8  ;;  %p3009_p5 = por %p3426_p3, %p46_p8 }
  0x66   : > { %s3014_s24 = sand.u32 1, %s2786_s29   ;;  %s2218_s20 = sshll.u32 %s2790_s30, 7 }
  0x67   : > { %s2217_s25 = sshll.u32 %s3014_s24, 3  ;;  %s3428_s0 = sld [smem:[#allocation22_spill]] }
  0x68   : > { %s308_s15 = scalar_lea.vmem [#allocation2], %s2217_s25  ;;  %p3023_p11 = pnand %p2469_p6, %p48_p10 }
  0x69   : > { %s315_s18 = sshll.u32 %s308_s15, 4  ;;  %s2219_s16 = sshll.u32 %s3014_s24, 4  ;;  %s3027_s18 = int_to_ptr.vmem [resolvable:$true] %s315_s18 }
  0x6a   : > { %s305_s12 = scalar_lea.sflag [#allocation3], %s3014_s24  ;;  %p2622_p9 = pneg %p3023_p11 }
  0x6d   : > { %s3021_s17 = scalar_lea.hbm %s3428_s0, %s2218_s20  ;;  %s2625_s10 = scalar_lea.hbm %s3428_s0, 256 }
  0x6e   : > { %s2620_s19 = scalar_lea.hbm %s3021_s17, 128  ;;  %p2626_p1 = scmp.lt.u32.totalorder %s3021_s17, %s3428_s0 }
  0x6f   : > { %p2621_p7 = scmp.ne.s32.totalorder %s3021_s17, %s2620_s19  ;;  %p2627_p2 = scmp.lt.u32.totalorder %s2625_s10, %s2620_s19 }
  0x70   : > { %p2629_p8 = scmp.lt.u32.totalorder %s2620_s19, %s3021_s17 }
  0x71   : > { %p2623_p12 = pnand %p2622_p9, %p2621_p7  ;;  %p2628_p4 = por %p2627_p2, %p2626_p1 }
  0x73   : > { %p2624_p0 = pneg %p2623_p12  ;;  %p2630_p13 = por %p2629_p8, %p2628_p4 }
  0x75   : > { %p2631_p6 = pnand %p2630_p13, %p2624_p0 }
  0x77   : > { %2634 = shalt.err (!%p2631_p6)
}
  0x78   : > { %s2635_s21 = scalar_lea.vmem %s3027_s18, 128  ;;  %s2797_s20 = smov [#allocation2]  }
  0x79   : > { %p2636_p10 = scmp.ne.s32.totalorder %s3027_s18, %s2635_s21  ;;  %s2640_s25 = sshll.u32 %s2797_s20, 4  ;;  %s2641_s25 = int_to_ptr.vmem [resolvable:$false] %s2640_s25 }
  0x7a   : > { %s2642_s14 = scalar_lea.vmem %s2641_s25, 256  ;;  %p2643_p12 = scmp.lt.s32.totalorder %s3027_s18, %s2641_s25 }
  0x7b   : > { %p2638_p3 = pnand %p2636_p10, %p2622_p9  ;;  %p2644_p1 = scmp.lt.s32.totalorder %s2642_s14, %s2635_s21 }
  0x7d   : > { %p2639_p7 = pneg %p2638_p3  ;;  %p2645_p2 = por %p2644_p1, %p2643_p12 }
  0x7f   : > { %p2646_p4 = pnand %p2645_p2, %p2639_p7 }
  0x81   : > { %2649 = shalt.err (!%p2646_p4)
}
  0x82   : > { %2455 = dma.hbm_to_vmem [thread:$0]  (!%p3023_p11), %s3021_s17, 128, %s3027_s18, %s305_s12  }
  0x83   : > { %s326_s19 = scalar_lea.vmem [#allocation5], %s2219_s16  ;;  %s322_s15 = sand.u32 1, %s2790_s30  }
  0x84   : > { %s333_s10 = sshll.u32 %s326_s19, 4  ;;  %s2268_s20 = sshll.u32 %s2790_s30, 8  ;;  %s3059_s10 = int_to_ptr.vmem [resolvable:$true] %s333_s10 }
  0x85   : > { %s3065_s14 = scalar_lea.hbm %s3401_s1, %s2268_s20  ;;  %s3067_s0 = scalar_lea.sflag [#allocation6], %s322_s15 }
  0x86   : > { %s2650_s4 = scalar_lea.hbm %s3065_s14, 256  ;;  %s2655_s18 = scalar_lea.hbm %s3401_s1, 512 }
  0x87   : > { %p2651_p0 = scmp.ne.s32.totalorder %s3065_s14, %s2650_s4  ;;  %p2656_p6 = scmp.lt.u32.totalorder %s3065_s14, %s3401_s1 }
  0x88   : > { %p2657_p10 = scmp.lt.u32.totalorder %s2655_s18, %s2650_s4  ;;  %p2659_p7 = scmp.lt.u32.totalorder %s2650_s4, %s3065_s14 }
  0x89   : > { %p2653_p8 = pnand %p2651_p0, %p2622_p9 }
  0x8a   : > { %p2658_p3 = por %p2657_p10, %p2656_p6 }
  0x8b   : > { %p2654_p13 = pneg %p2653_p8 }
  0x8c   : > { %p2660_p12 = por %p2659_p7, %p2658_p3 }
  0x8e   : > { %p2661_p1 = pnand %p2660_p12, %p2654_p13 }
  0x90   : > { %2664 = shalt.err (!%p2661_p1)
}
  0x91   : > { %s2665_s19 = scalar_lea.vmem %s3059_s10, 256  ;;  %s2798_s15 = smov [#allocation5]  }
  0x92   : > { %p2666_p2 = scmp.ne.s32.totalorder %s3059_s10, %s2665_s19  ;;  %s2670_s20 = sshll.u32 %s2798_s15, 4  ;;  %s2671_s20 = int_to_ptr.vmem [resolvable:$false] %s2670_s20 }
  0x93   : > { %s2672_s21 = scalar_lea.vmem %s2671_s20, 512  ;;  %p2673_p8 = scmp.lt.s32.totalorder %s3059_s10, %s2671_s20 }
  0x94   : > { %p2668_p4 = pnand %p2666_p2, %p2622_p9  ;;  %p2674_p6 = scmp.lt.s32.totalorder %s2672_s21, %s2665_s19 }
  0x96   : > { %p2669_p0 = pneg %p2668_p4  ;;  %p2675_p10 = por %p2674_p6, %p2673_p8 }
  0x98   : > { %p2676_p3 = pnand %p2675_p10, %p2669_p0 }
  0x9a   : > { %2679 = shalt.err (!%p2676_p3)
}
  0x9b   : > { %s3430_s4 = smov 8   ;;  %s3431_s25 = smov 128  }
  0x9c   : > { %2458 = dma.hbm_to_vmem [thread:$0]  (!%p3023_p11), %s3065_s14, 256, %s3059_s10, %s3067_s0, %s3431_s25, %s3431_s25, %s3430_s4  }
  0x9d   : > { %p3432_p9 = scmp.ne.s32.totalorder %s3422_s13, 0 }
  0x9e   : > { %s3099_s24 = sand.u32 (!%p3432_p9), 1, %s2782_s28   ;;  %p3433_p13 = scmp.ne.s32.totalorder (!%p3432_p9), %s3419_s11, 0 }
  0x9f   : > { %345 = sbr.rel (%p3432_p9) target bundleno = 1699 (0x6a3), region = 48  ;;  %s2223_s17 = sshll.u32 (!%p3432_p9), %s3099_s24, 3 }
  0xa0   : > { %s348_s18 = scalar_lea.sflag (!%p3432_p9), [#allocation3], %s3099_s24  ;;  %s351_s27 = scalar_lea.vmem (!%p3432_p9), [#allocation2], %s2223_s17 }
  0xa6   : > { %2753 = dma.done.wait (%p3433_p13), %s348_s18, 128  }
  0xa7   : > { %2755 = vsyncadd (%p3433_p13), %s348_s18, 4294967168  ;;  %s356_s0 = sand.u32 1, %s2876_s9   ;;  %s2224_s13 = sshll.u32 %s3099_s24, 4 }
  0xa8   : > { %s357_s10 = scalar_lea.sflag [#allocation6], %s356_s0  ;;  %s360_s14 = scalar_lea.vmem [#allocation5], %s2224_s13 }
  0xa9   : > { %2757 = dma.done.wait (%p3433_p13), %s357_s10, 256  }
  0xaa   : > { %2759 = vsyncadd (%p3433_p13), %s357_s10, 4294967040  ;;  %p3434_p11 = scmp.eq.s32.totalorder %s2876_s9, 0 }
  0xac   : > { %2761 = dma.done.wait (%p3434_p11), [#allocation6], 512   ;;  %p3435_p7 = pmov %p3434_p11 }
  0xae   : > { %2763 = vsyncadd (%p3435_p7), [#allocation6], 4294966784  ;;  %p3436_p12 = pmov %p3435_p7 }
  0xaf   : > { %p3437_p1 = pmov %p3435_p7 }
  0xb0   : > { %2765 = dma.done.wait (%p3436_p12), [#allocation9], 896  }
  0xb1   : > { %2767 = vsyncadd (%p3437_p1), [#allocation9], 4294966400  ;;  %vm418_vm0 = vcmask 261120   ;;  %v415_v0 = vld [vmem:[%s351_s27] sm:$0xff]  ;;  %v533_v2 = vld [vmem:[#allocation8] sm:$0xff]  ;;  %vm536_vm1 = vcmask 195584   ;;  %v633_v39 = vlaneseq }
  0xb2   : > { %v419_v1 = vsel %vm418_vm0, %v415_v0, 0.0  ;;  %v534_v3 = vld [vmem:[#allocation8 + $0x8] sm:$0xff]  ;;  %v531_v5 = vld [vmem:[%s360_s14] sm:$0xff]  ;;  %v2799_v16 = vmov 0.0|0.0   ;;  %v457_v18 = vld [vmem:[#allocation7 + $0x18] sm:$0xff]  ;;  %vm2800_vm2 = vmmov 0  }
  0xb3   : > { %420 = vadd.xlane.f32.xlu0 %v419_v1  ;;  %v2394_v4 = vpack.c.bf16 %v534_v3, %v533_v2  ;;  %v535_v6 = vld [vmem:[#allocation8 + $0x10] sm:$0xff]  ;;  %2323 = vmatprep.mubr.msk.f32.mxu1 %vm536_vm1, %v531_v5  ;;  %v532_v7 = vld [vmem:[%s360_s14 + $0x8] sm:$0xff]  ;;  %v454_v13 = vld [vmem:[#allocation7] sm:$0xff]  ;;  %v2801_v19 = vmov 0.0   ;;  %vm618_vm3 = vcmask 523264   ;;  %s3139_s11 = scalar_lea.vmem [#allocation12], %s2224_s13 }
  0xb4   : > { %v455_v14 = vld [vmem:[#allocation7 + $0x8] sm:$0xff]  ;;  %v456_v15 = vld [vmem:[#allocation7 + $0x10] sm:$0xff]  ;;  %2388 = vmatprep.subr.bf16.mxu0 %v2799_v16  ;;  %2314 = vmatprep.mubr.msk.f32.mxu0 %vm2800_vm2, %v2801_v19  ;;  %s2802_s16 = smov 112   ;;  %s2803_s12 = smov 96   ;;  %v2804_v37 = vmov 1983009808  }
  0xb5   : > { %2395 = vmatprep.subr.bf16.mxu1 %v2394_v4  ;;  %v2389_v17 = vpack.c.bf16 %v455_v14, %v454_v13  ;;  %v2392_v20 = vpack.c.bf16 %v457_v18, %v456_v15  ;;  %v2230_v32 = vld [vmem:[%s3402_s2] ss:$0 sm:$0xff]  ;;  %v631_v38 = vunpack.c.l.s4 %v2804_v37  ;;  %v634_v42 = vshrl.u32 %v633_v39, 7  ;;  %s2055_s4 = sshll.u32 %s3139_s11, 4  ;;  %s2269_s25 = sshll.u32 %s2876_s9, 8  ;;  %s3315_s4 = int_to_ptr.vmem [resolvable:$true] %s2055_s4 }
  0xb6   : > { %2397 = vmatpush3.bf16.msra.mxu1 %v2394_v4  ;;  %v2231_v34 = vld [vmem:[%s3403_s3] ss:$0 sm:$0xff]  ;;  %v2805_v43 = vmov 1934713408   ;;  %vm1227_vm6 = vcmask 130048   ;;  %vm1532_vm8 = vcmask 64512   ;;  %s3321_s0 = scalar_lea.hbm %s3408_s8, %s2269_s25 }
  0xb7   : > { %2321 = vmatprep.subr.mxu1 %v535_v6  ;;  %2390 = vmatpush3.bf16.msra.mxu0 %v2389_v17  ;;  %v632_v41 = vunpack.c.0.s8 %v631_v38  ;;  %v662_v44 = vunpack.c.l.s4 %v2805_v43  ;;  %vm2400_vm7 = vmpackc.low %vm1227_vm6, %vm1227_vm6  ;;  %s2029_s13 = scalar_lea.sflag [#allocation13], %s3099_s24  ;;  %s2680_s10 = scalar_lea.vmem %s3315_s4, 256 }
  0xb8   : > { %2391 = vmatprep.subr.bf16.mxu0 %v2799_v16  ;;  %p2681_p2 = scmp.ne.s32.totalorder %s3315_s4, %s2680_s10  ;;  %s2806_s14 = smov [#allocation12]  }
  0xb9   : > { %v3161_v46 = vsub.s32 %v632_v41, %v634_v42  ;;  %v663_v51 = vunpack.c.0.s8 %v662_v44 }
  0xba   : > { %2322 = vmatpush3.msra.mxu1 %v535_v6  ;;  %p2682_p4 = pnand %p2681_p2, %p3009_p5 }
  0xbb   : > { %2324 = vmatmul.mubr.msk.f32.vlgmr.msra.gmra.mrb[0].mxu1 %vm536_vm1, %v532_v7  ;;  %2398 = vmatprep.subr.bf16.mxu1 %v2799_v16  ;;  %v3181_v60 = vsub.s32 %v663_v51, %v634_v42 }
  0xbc   : > { %2330 = vmatprep.mubr.msk.f32.mxu1 %vm2800_vm2, %v2801_v19  ;;  %2393 = vmatpush3.bf16.msra.mxu0 %v2392_v20  ;;  %p2683_p0 = pneg %p2682_p4 }
  0xbd   : > { %2402 = vmatprep.subr.bf16.mxu0 %v2799_v16 }
 0x140   : > { %v421_v8 = vpop.xlane.xlu0 %420 }
 0x141   : > { %v423_v9 = vmul.f32 0.03125, %v421_v8 }
 0x143   : > { %v424_v10 = vsub.f32 %v415_v0, %v423_v9 }
 0x145   : > { %v425_v11 = vmul.f32 %v424_v10, %v424_v10 }
 0x147   : > { %v426_v12 = vsel %vm418_vm0, %v425_v11, 0.0 }
 0x148   : > { %427 = vadd.xlane.f32.xlu0 %v426_v12 }
 0x18e   : > { %v3135_v21 = vpop.f32.mrb[0].mxu1 }
 0x18f   : > { %620 = vst.msk [vmem:[%s3139_s11 + $0x8] sm:$0xff] %vm618_vm3, %v3135_v21  ;;  %v609_v22 = vpop.f32.mrb[1].mxu1  ;;  %v695_v47 = vcombine.high %v3135_v21, %v2801_v19  ;;  %v702_v54 = vrot.slane %v3135_v21, %v3161_v46 }
 0x190   : > { %619 = vst.msk [vmem:[%s3139_s11] sm:$0xff] %vm618_vm3, %v609_v22  ;;  %623 = vrot.lane.b32.xlu1 %v609_v22, %s2802_s16  ;;  %v629_v48 = vcombine.high %v609_v22, %v2801_v19  ;;  %v636_v52 = vrot.slane %v609_v22, %v3161_v46 }
 0x191   : > { %v709_v58 = vrot.slane %v695_v47, %v3161_v46 }
 0x192   : > { %v643_v56 = vrot.slane %v629_v48, %v3161_v46 }
 0x194   : > { %625 = vrot.lane.b32.xlu1 %v3135_v21, %s2802_s16 }
 0x198   : > { %861 = vrot.lane.b32.xlu1 %v609_v22, %s2803_s12 }
 0x1d5   : > { %v428_v23 = vpop.xlane.xlu0 %427 }
 0x1d6   : > { %v429_v24 = vmul.f32 0.03125, %v428_v23 }
 0x1d8   : > { %v430_v25 = vadd.f32 1e-05, %v429_v24 }
 0x1da   : > { %2520 = vrsqrt.f32 %v430_v25  ;;  %vm433_vm4 = vcmp.eq.f32.partialorder %v430_v25, inf  ;;  %v436_v28 = vand.u32 2147483648, %v430_v25  ;;  %vm435_vm5 = vcmp.eq.f32.partialorder %v430_v25, 0.0 }
 0x1e4   : > { %v2521_v26 = vpop.eup %2520 }
 0x1e5   : > { %v432_v27 = vmul.f32 %v2521_v26, %v430_v25 }
 0x1e7   : > { %v434_v29 = vsel %vm433_vm4, %v430_v25, %v432_v27 }
 0x1e8   : > { %v437_v30 = vsel %vm435_vm5, %v436_v28, %v434_v29 }
 0x1e9   : > { %2522 = vrcp.f32 %v437_v30 }
 0x1f3   : > { %v2523_v31 = vpop.eup %2522 }
 0x1f4   : > { %v439_v33 = vmul.f32 %v2523_v31, %v424_v10 }
 0x1f6   : > { %v446_v35 = vmul.f32 %v2230_v32, %v439_v33 }
 0x1f8   : > { %v453_v36 = vadd.f32 %v2231_v34, %v446_v35 }
 0x1fa   : > { %2315 = vmatmul.mubr.msk.f32.vlgmr.msra.gmra.mrb[0].mxu0 %vm418_vm0, %v453_v36 }
 0x1fb   : > { %2337 = vmatprep.mubr.msk.f32.mxu0 %vm2800_vm2, %v2801_v19 }
 0x202   : > { %v3157_v40 = vpop.permute.xlu1 %623 }
 0x203   : > { %v644_v49 = vcombine.high %v3157_v40, %v2801_v19  ;;  %v651_v53 = vrot.slane %v3157_v40, %v3161_v46 }
 0x205   : > { %v658_v57 = vrot.slane %v644_v49, %v3161_v46  ;;  %v659_v61 = vcombine.low %v636_v52, %v651_v53  ;;  %v660_v62 = vcombine.high %v636_v52, %v651_v53 }
 0x206   : > { %v3159_v45 = vpop.permute.xlu1 %625 }
 0x207   : > { %v710_v50 = vcombine.high %v3159_v45, %v2801_v19  ;;  %v717_v55 = vrot.slane %v3159_v45, %v3161_v46  ;;  %v675_v1 = vcombine.low %v643_v56, %v658_v57  ;;  %v676_v2 = vcombine.high %v643_v56, %v658_v57 }
 0x208   : > { %v667_v5 = vrot.slane %v659_v61, %v3181_v60  ;;  %v674_v6 = vrot.slane %v660_v62, %v3181_v60 }
 0x209   : > { %v724_v59 = vrot.slane %v710_v50, %v3161_v46  ;;  %v725_v63 = vcombine.low %v702_v54, %v717_v55  ;;  %v726_v0 = vcombine.high %v702_v54, %v717_v55  ;;  %v683_v9 = vrot.slane %v675_v1, %v3181_v60 }
 0x20a   : > { %v690_v10 = vrot.slane %v676_v2, %v3181_v60  ;;  %v761_v13 = vcombine.low %v667_v5, %v674_v6  ;;  %v2235_v14 = vcombine.high %v667_v5, %v674_v6 }
 0x20b   : > { %v741_v3 = vcombine.low %v709_v58, %v724_v59  ;;  %v742_v4 = vcombine.high %v709_v58, %v724_v59  ;;  %v733_v7 = vrot.slane %v725_v63, %v3181_v60  ;;  %v740_v8 = vrot.slane %v726_v0, %v3181_v60 }
 0x20c   : > { %v777_v18 = vcombine.low %v683_v9, %v690_v10  ;;  %v2236_v20 = vcombine.high %v683_v9, %v690_v10  ;;  %v768_v24 = vrot.slane %v761_v13, %v3161_v46  ;;  %v776_v25 = vrot.slane %v2235_v14, %v3161_v46 }
 0x20d   : > { %v749_v11 = vrot.slane %v741_v3, %v3181_v60  ;;  %v756_v12 = vrot.slane %v742_v4, %v3181_v60  ;;  %v811_v15 = vcombine.low %v733_v7, %v740_v8  ;;  %v2237_v17 = vcombine.high %v733_v7, %v740_v8 }
 0x20e   : > { %v784_v28 = vrot.slane %v777_v18, %v3161_v46  ;;  %v792_v29 = vrot.slane %v2236_v20, %v3161_v46  ;;  %v793_v32 = vcombine.low %v768_v24, %v776_v25 }
 0x20f   : > { %v827_v22 = vcombine.low %v749_v11, %v756_v12  ;;  %v2238_v23 = vcombine.high %v749_v11, %v756_v12  ;;  %v818_v26 = vrot.slane %v811_v15, %v3161_v46  ;;  %v826_v27 = vrot.slane %v2237_v17, %v3161_v46 }
 0x210   : > { %v801_v34 = vcombine.low %v784_v28, %v792_v29  ;;  %v800_v36 = vrot.slane %v793_v32, %v3181_v60 }
 0x211   : > { %v834_v30 = vrot.slane %v827_v22, %v3161_v46  ;;  %v842_v31 = vrot.slane %v2238_v23, %v3161_v46  ;;  %v843_v33 = vcombine.low %v818_v26, %v826_v27 }
 0x212   : > { %v808_v38 = vrot.slane %v801_v34, %v3181_v60  ;;  %v862_v34 = vpop.permute.xlu1 %861 }
 0x213   : > { %v851_v35 = vcombine.low %v834_v30, %v842_v31  ;;  %v850_v37 = vrot.slane %v843_v33, %v3181_v60 }
 0x214   : > { %v809_v41 = vcombine.low %v800_v36, %v808_v38  ;;  %v810_v43 = vcombine.high %v800_v36, %v808_v38 }
 0x215   : > { %v858_v39 = vrot.slane %v851_v35, %v3181_v60 }
 0x217   : > { %v859_v42 = vcombine.low %v850_v37, %v858_v39  ;;  %v860_v44 = vcombine.high %v850_v37, %v858_v39 }
 0x219   : > { %v2399_v47 = vpack.c.bf16 %v859_v42, %v809_v41  ;;  %v2403_v48 = vpack.c.bf16 %v860_v44, %v810_v43 }
 0x21b   : > { %2401 = vmatpush3.bf16.xpose.msk.msra.mxu1 %vm2400_vm7, %v2399_v47  ;;  %2405 = vmatpush3.bf16.xpose.msk.msra.mxu0 %vm2400_vm7, %v2403_v48  ;;  %v873_v47 = vcombine.high %v862_v34, %v2801_v19 }
 0x21c   : > { %2340 = vmatprep.subr.mxu1 %v2801_v19  ;;  %2345 = vmatprep.subr.mxu0 %v2801_v19 }
 0x2cd   : > { %v527_v49 = vpop.f32.mrb[0].mxu0 }
 0x2ce   : > { %1106 = vrot.lane.b32.xlu0 %v527_v49, %s2802_s16  ;;  %v2316_v50 = vpop.f32.mrb[1].mxu0  ;;  %v1109_v51 = vcombine.high %v527_v49, %v2801_v19  ;;  %v1116_v53 = vrot.slane %v527_v49, %v3161_v46  ;;  %s2684_s16 = sshll.u32 %s2806_s14, 4  ;;  %s2685_s16 = int_to_ptr.vmem [resolvable:$false] %s2684_s16 }
 0x2cf   : > { %v880_v50 = vrot.slane %v862_v34, %v3161_v46  ;;  %s2686_s11 = scalar_lea.vmem %s2685_s16, 512  ;;  %p2687_p8 = scmp.lt.s32.totalorder %s3315_s4, %s2685_s16 }
 0x2d0   : > { %v1123_v56 = vrot.slane %v1109_v51, %v3161_v46  ;;  %p2688_p6 = scmp.lt.s32.totalorder %s2686_s11, %s2680_s10 }
 0x2d2   : > { %p2689_p10 = por %p2688_p6, %p2687_p8 }
 0x2d4   : > { %p2690_p3 = pnand %p2689_p10, %p2683_p0 }
 0x340   : > { %v1107_v52 = vpop.permute.xlu0 %1106 }
 0x341   : > { %v1124_v54 = vcombine.high %v1107_v52, %v2801_v19  ;;  %v1131_v55 = vrot.slane %v1107_v52, %v3161_v46 }
 0x343   : > { %v1138_v57 = vrot.slane %v1124_v54, %v3161_v46  ;;  %v1139_v58 = vcombine.low %v1116_v53, %v1131_v55  ;;  %v1140_v59 = vcombine.high %v1116_v53, %v1131_v55  ;;  %v887_v54 = vrot.slane %v873_v47, %v3161_v46 }
 0x345   : > { %v1147_v61 = vrot.slane %v1139_v58, %v3181_v60  ;;  %v1154_v62 = vrot.slane %v1140_v59, %v3181_v60  ;;  %v1155_v63 = vcombine.low %v1123_v56, %v1138_v57  ;;  %v1156_v0 = vcombine.high %v1123_v56, %v1138_v57 }
 0x347   : > { %v1163_v1 = vrot.slane %v1155_v63, %v3181_v60  ;;  %v1170_v2 = vrot.slane %v1156_v0, %v3181_v60  ;;  %v1175_v3 = vcombine.low %v1147_v61, %v1154_v62  ;;  %v2243_v4 = vcombine.high %v1147_v61, %v1154_v62 }
 0x349   : > { %v1182_v5 = vrot.slane %v1175_v3, %v3161_v46  ;;  %v1190_v6 = vrot.slane %v2243_v4, %v3161_v46  ;;  %v1191_v7 = vcombine.low %v1163_v1, %v1170_v2  ;;  %v2244_v8 = vcombine.high %v1163_v1, %v1170_v2 }
 0x34b   : > { %v1198_v9 = vrot.slane %v1191_v7, %v3161_v46  ;;  %v1206_v10 = vrot.slane %v2244_v8, %v3161_v46  ;;  %v1207_v11 = vcombine.low %v1182_v5, %v1190_v6 }
 0x34d   : > { %v1215_v12 = vcombine.low %v1198_v9, %v1206_v10  ;;  %v1214_v13 = vrot.slane %v1207_v11, %v3181_v60 }
 0x34f   : > { %v1222_v14 = vrot.slane %v1215_v12, %v3181_v60 }
 0x351   : > { %v3224_v15 = vcombine.low %v1214_v13, %v1222_v14  ;;  %v3226_v17 = vcombine.high %v1214_v13, %v1222_v14 }
 0x353   : > { %v1225_v18 = vmul.f32 0.25, %v3224_v15  ;;  %v1226_v20 = vmul.f32 0.25, %v3226_v17 }
 0x355   : > { %2331 = vmatmul.mubr.msk.f32.vlgmr.msra.gmra.mrb[2].mxu1 %vm1227_vm6, %v1225_v18  ;;  %2338 = vmatmul.mubr.msk.f32.vlgmr.msra.gmra.mrb[2].mxu0 %vm1227_vm6, %v1226_v20 }
 0x356   : > { %2341 = vmatpush3.xpose.msk.msra.mxu1 %vm1227_vm6, %v3224_v15  ;;  %2346 = vmatpush3.xpose.msk.msra.mxu0 %vm1227_vm6, %v3226_v17 }
 0x357   : > { %2342 = vmatprep.mubr.msk.f32.mxu1 %vm2800_vm2, %v2801_v19  ;;  %2347 = vmatprep.mubr.msk.f32.mxu0 %vm2800_vm2, %v2801_v19 }
 0x358   : > { %2406 = vmatprep.subr.bf16.mxu1 %v2799_v16  ;;  %2409 = vmatprep.subr.bf16.mxu0 %v2799_v16 }
 0x359   : > { %2343 = vmatmul.mubr.msk.f32.vlgmr.msra.gmra.mrb[4].mxu1 %vm1227_vm6, %v1225_v18  ;;  %2348 = vmatmul.mubr.msk.f32.vlgmr.msra.gmra.mrb[4].mxu0 %vm1227_vm6, %v1226_v20 }
 0x35a   : > { %2354 = vmatprep.mubr.msk.f32.mxu1 %vm2800_vm2, %v2801_v19  ;;  %2361 = vmatprep.mubr.msk.f32.mxu0 %vm2800_vm2, %v2801_v19 }
 0x428   : > { %v1303_v22 = vpop.f32.mrb[2].mxu1  ;;  %v1382_v23 = vpop.f32.mrb[2].mxu0 }
 0x429   : > { %v2332_v24 = vpop.f32.mrb[3].mxu1  ;;  %v2339_v25 = vpop.f32.mrb[3].mxu0  ;;  %v1539_v26 = vsel %vm1227_vm6, %v1303_v22, -inf  ;;  %v1542_v31 = vsel %vm1227_vm6, %v1382_v23, -inf }
 0x42a   : > { %1540 = vmax.xlane.f32.xlu1 %v1539_v26 }
 0x42c   : > { %v1455_v27 = vpop.f32.mrb[4].mxu1  ;;  %v1528_v28 = vpop.f32.mrb[4].mxu0 }
 0x42d   : > { %v2344_v29 = vpop.f32.mrb[5].mxu1  ;;  %v2349_v30 = vpop.f32.mrb[5].mxu0  ;;  %v1536_v32 = vsel %vm1532_vm8, %v1528_v28, -inf  ;;  %v1533_v33 = vsel %vm1532_vm8, %v1455_v27, -inf }
 0x42e   : > { %1543 = vmax.xlane.f32.xlu1 %v1542_v31  ;;  %1537 = vmax.xlane.f32.xlu0 %v1536_v32 }
 0x432   : > { %1534 = vmax.xlane.f32.xlu1 %v1533_v33 }
 0x443   : > { %865 = vrot.lane.b32.xlu1 %v3157_v40, %s2803_s12 }
 0x444   : > { %863 = vrot.lane.b32.xlu0 %v3135_v21, %s2803_s12 }
 0x447   : > { %867 = vrot.lane.b32.xlu1 %v3159_v45, %s2803_s12 }
 0x4b7   : > { %v1541_v35 = vpop.xlane.xlu1 %1540 }
 0x4bb   : > { %v1544_v36 = vpop.xlane.xlu1 %1543  ;;  %v1538_v37 = vpop.xlane.xlu0 %1537 }
 0x4bc   : > { %v1546_v38 = vmax.f32 %v1538_v37, %v1544_v36 }
 0x4be   : > { %v1548_v39 = vsub.f32 %v1528_v28, %v1546_v38  ;;  %v1554_v41 = vsub.f32 %v1382_v23, %v1546_v38 }
 0x4bf   : > { %v1535_v42 = vpop.xlane.xlu1 %1534  ;;  %v864_v51 = vpop.permute.xlu0 %863 }
 0x4c0   : > { %v1551_v43 = vmul.f32 1.442695, %v1548_v39  ;;  %v1545_v44 = vmax.f32 %v1535_v42, %v1541_v35  ;;  %v1557_v48 = vmul.f32 1.442695, %v1554_v41  ;;  %v939_v59 = vcombine.high %v864_v51, %v2801_v19 }
 0x4c1   : > { %v946_v2 = vrot.slane %v864_v51, %v3161_v46 }
 0x4c2   : > { %2524 = vpow2.f32 %v1551_v43  ;;  %v1547_v40 = vsub.f32 %v1455_v27, %v1545_v44  ;;  %v1553_v49 = vsub.f32 %v1303_v22, %v1545_v44  ;;  %v953_v9 = vrot.slane %v939_v59, %v3161_v46 }
 0x4c3   : > { %v866_v21 = vpop.permute.xlu1 %865  ;;  %2526 = vpow2.f32 %v1557_v48 }
 0x4c4   : > { %v1549_v45 = vmul.f32 1.442695, %v1547_v40  ;;  %v888_v52 = vcombine.high %v866_v21, %v2801_v19  ;;  %v895_v53 = vrot.slane %v866_v21, %v3161_v46  ;;  %v1555_v55 = vmul.f32 1.442695, %v1553_v49 }
 0x4c6   : > { %2528 = vpow2.f32 %v1549_v45  ;;  %v902_v56 = vrot.slane %v888_v52, %v3161_v46  ;;  %v903_v57 = vcombine.low %v880_v50, %v895_v53  ;;  %v904_v58 = vcombine.high %v880_v50, %v895_v53 }
 0x4c7   : > { %v868_v61 = vpop.permute.xlu1 %867  ;;  %2530 = vpow2.f32 %v1555_v55 }
 0x4c8   : > { %v911_v62 = vrot.slane %v903_v57, %v3181_v60  ;;  %v918_v63 = vrot.slane %v904_v58, %v3181_v60  ;;  %v919_v0 = vcombine.low %v887_v54, %v902_v56  ;;  %v920_v1 = vcombine.high %v887_v54, %v902_v56 }
 0x4c9   : > { %v954_v3 = vcombine.high %v868_v61, %v2801_v19  ;;  %v961_v4 = vrot.slane %v868_v61, %v3161_v46  ;;  %v1872_v61 = vld [vmem:[#allocation10 + $0x18] sm:$0xff] }
 0x4ca   : > { %v927_v5 = vrot.slane %v919_v0, %v3181_v60  ;;  %v934_v6 = vrot.slane %v920_v1, %v3181_v60  ;;  %v1005_v7 = vcombine.low %v911_v62, %v918_v63  ;;  %v2239_v8 = vcombine.high %v911_v62, %v918_v63 }
 0x4cb   : > { %v968_v10 = vrot.slane %v954_v3, %v3161_v46  ;;  %v969_v11 = vcombine.low %v946_v2, %v961_v4  ;;  %v970_v12 = vcombine.high %v946_v2, %v961_v4 }
 0x4cc   : > { %v2525_v13 = vpop.eup %2524  ;;  %v1012_v14 = vrot.slane %v1005_v7, %v3161_v46  ;;  %v1021_v18 = vcombine.low %v927_v5, %v934_v6  ;;  %v2240_v20 = vcombine.high %v927_v5, %v934_v6  ;;  %v1020_v26 = vrot.slane %v2239_v8, %v3161_v46 }
 0x4cd   : > { %v977_v22 = vrot.slane %v969_v11, %v3181_v60  ;;  %v984_v23 = vrot.slane %v970_v12, %v3181_v60  ;;  %v985_v24 = vcombine.low %v953_v9, %v968_v10  ;;  %v986_v25 = vcombine.high %v953_v9, %v968_v10  ;;  %v2527_v30 = vpop.eup %2526 }
 0x4ce   : > { %v1028_v27 = vrot.slane %v1021_v18, %v3161_v46  ;;  %v1036_v28 = vrot.slane %v2240_v20, %v3161_v46  ;;  %v1562_v29 = vsel %vm1532_vm8, %v2525_v13, 0.0  ;;  %v1037_v42 = vcombine.low %v1012_v14, %v1020_v26 }
 0x4cf   : > { %v993_v31 = vrot.slane %v985_v24, %v3181_v60  ;;  %v1000_v32 = vrot.slane %v986_v25, %v3181_v60  ;;  %v1055_v33 = vcombine.low %v977_v22, %v984_v23  ;;  %v2241_v34 = vcombine.high %v977_v22, %v984_v23  ;;  %1563 = vadd.xlane.f32.xlu0 %v1562_v29 }
 0x4d0   : > { %v2529_v35 = vpop.eup %2528  ;;  %v1045_v36 = vcombine.low %v1028_v27, %v1036_v28  ;;  %v1568_v44 = vsel %vm1227_vm6, %v2527_v30, 0.0  ;;  %v1044_v51 = vrot.slane %v1037_v42, %v3181_v60 }
 0x4d1   : > { %v1062_v37 = vrot.slane %v1055_v33, %v3161_v46  ;;  %v1070_v38 = vrot.slane %v2241_v34, %v3161_v46  ;;  %v1071_v39 = vcombine.low %v993_v31, %v1000_v32  ;;  %v2242_v41 = vcombine.high %v993_v31, %v1000_v32  ;;  %v2531_v47 = vpop.eup %2530 }
 0x4d2   : > { %v1559_v43 = vsel %vm1532_vm8, %v2529_v35, 0.0  ;;  %v1052_v21 = vrot.slane %v1045_v36, %v3181_v60  ;;  %v1565_v45 = vsel %vm1227_vm6, %v2531_v47, 0.0 }
 0x4d3   : > { %v1078_v48 = vrot.slane %v1071_v39, %v3161_v46  ;;  %v1086_v40 = vrot.slane %v2242_v41, %v3161_v46  ;;  %v1087_v49 = vcombine.low %v1062_v37, %v1070_v38  ;;  %1560 = vadd.xlane.f32.xlu1 %v1559_v43  ;;  %1569 = vadd.xlane.f32.xlu0 %v1568_v44 }
 0x4d4   : > { %v1053_v54 = vcombine.low %v1044_v51, %v1052_v21  ;;  %v1054_v56 = vcombine.high %v1044_v51, %v1052_v21 }
 0x4d5   : > { %v1095_v50 = vcombine.low %v1078_v48, %v1086_v40  ;;  %v1094_v52 = vrot.slane %v1087_v49, %v3181_v60 }
 0x4d7   : > { %1566 = vadd.xlane.f32.xlu1 %v1565_v45  ;;  %v1102_v53 = vrot.slane %v1095_v50, %v3181_v60  ;;  %v1869_v60 = vld [vmem:[#allocation10] sm:$0xff] }
 0x4d9   : > { %v1103_v55 = vcombine.low %v1094_v52, %v1102_v53  ;;  %v1104_v57 = vcombine.high %v1094_v52, %v1102_v53 }
 0x4db   : > { %v2407_v46 = vpack.c.bf16 %v1103_v55, %v1053_v54  ;;  %v2410_v58 = vpack.c.bf16 %v1104_v57, %v1054_v56 }
 0x4dd   : > { %2408 = vmatpush3.bf16.msra.mxu1 %v2407_v46  ;;  %2411 = vmatpush3.bf16.msra.mxu0 %v2410_v58 }
 0x4de   : > { %2364 = vmatprep.subr.mxu1 %v2801_v19  ;;  %2369 = vmatprep.subr.mxu0 %v2801_v19 }
 0x4e0   : > { %2355 = vmatmul.mubr.msk.f32.vlgmr.msra.gmra.mrb[6].mxu1 %vm1227_vm6, %v2531_v47  ;;  %2362 = vmatmul.mubr.msk.f32.vlgmr.msra.gmra.mrb[6].mxu0 %vm1227_vm6, %v2527_v30 }
 0x4e1   : > { %2365 = vmatpush3.msra.mxu1 %v3224_v15  ;;  %2370 = vmatpush3.msra.mxu0 %v3226_v17  ;;  %v1870_v15 = vld [vmem:[#allocation10 + $0x8] sm:$0xff]  ;;  %v1871_v17 = vld [vmem:[#allocation10 + $0x10] sm:$0xff] }
 0x4e2   : > { %2366 = vmatprep.mubr.msk.f32.mxu1 %vm2800_vm2, %v2801_v19  ;;  %2371 = vmatprep.mubr.msk.f32.mxu0 %vm2800_vm2, %v2801_v19  ;;  %v2413_v59 = vpack.c.bf16 %v1870_v15, %v1869_v60  ;;  %v2416_v62 = vpack.c.bf16 %v1872_v61, %v1871_v17 }
 0x4e3   : > { %2412 = vmatprep.subr.bf16.mxu1 %v2799_v16  ;;  %2415 = vmatprep.subr.bf16.mxu0 %v2799_v16 }
 0x4e8   : > { %2367 = vmatmul.mubr.msk.f32.vlgmr.msra.gmra.mrb[6].mxu1 %vm1532_vm8, %v2529_v35  ;;  %2372 = vmatmul.mubr.msk.f32.vlgmr.msra.gmra.mrb[6].mxu0 %vm1532_vm8, %v2525_v13 }
 0x4e9   : > { %2378 = vmatprep.mubr.msk.f32.mxu1 %vm2800_vm2, %v2801_v19  ;;  %2385 = vmatprep.mubr.msk.f32.mxu0 %vm2800_vm2, %v2801_v19 }
 0x4ea   : > { %2414 = vmatpush3.bf16.msra.mxu1 %v2413_v59  ;;  %2417 = vmatpush3.bf16.msra.mxu0 %v2416_v62 }
 0x55c   : > { %v1564_v63 = vpop.xlane.xlu0 %1563 }
 0x560   : > { %v1561_v16 = vpop.xlane.xlu1 %1560  ;;  %v1570_v0 = vpop.xlane.xlu0 %1569 }
 0x561   : > { %v1572_v2 = vadd.f32 %v1570_v0, %v1564_v63 }
 0x563   : > { %2532 = vrcp.f32 %v1572_v2 }
 0x564   : > { %v1567_v1 = vpop.xlane.xlu1 %1566 }
 0x565   : > { %v1571_v3 = vadd.f32 %v1567_v1, %v1561_v16 }
 0x567   : > { %2534 = vrcp.f32 %v1571_v3 }
 0x56d   : > { %v2533_v19 = vpop.eup %2532 }
 0x571   : > { %v2535_v4 = vpop.eup %2534 }
 0x5bb   : > { %v1788_v5 = vpop.f32.mrb[6].mxu1  ;;  %v1861_v6 = vpop.f32.mrb[6].mxu0 }
 0x5bc   : > { %v1866_v7 = vmul.f32 %v2535_v4, %v1788_v5  ;;  %v1868_v8 = vmul.f32 %v2533_v19, %v1861_v6  ;;  %v2368_v9 = vpop.f32.mrb[7].mxu1  ;;  %v2373_v10 = vpop.f32.mrb[7].mxu0 }
 0x5be   : > { %2379 = vmatmul.mubr.msk.f32.vlgmr.msra.gmra.mrb[8].mxu1 %vm1227_vm6, %v1866_v7  ;;  %2386 = vmatmul.mubr.msk.f32.vlgmr.msra.gmra.mrb[8].mxu0 %vm1227_vm6, %v1868_v8 }
 0x5bf   : > { %2693 = shalt.err (!%p2690_p3)
}
 0x5c0   : > { %s2694_s12 = scalar_lea.hbm %s3321_s0, 256  ;;  %s2698_s20 = scalar_lea.hbm %s3408_s8, 512 }
 0x5c1   : > { %p2695_p9 = scmp.ne.s32.totalorder %s3321_s0, %s2694_s12  ;;  %p2699_p7 = scmp.lt.u32.totalorder %s3321_s0, %s3408_s8 }
 0x5c2   : > { %p2700_p12 = scmp.lt.u32.totalorder %s2698_s20, %s2694_s12  ;;  %p2702_p2 = scmp.lt.u32.totalorder %s2694_s12, %s3321_s0 }
 0x5c3   : > { %p2696_p13 = pnand %p2695_p9, %p3009_p5 }
 0x5c4   : > { %p2701_p1 = por %p2700_p12, %p2699_p7 }
 0x5c5   : > { %p2697_p11 = pneg %p2696_p13 }
 0x5c6   : > { %p2703_p4 = por %p2702_p2, %p2701_p1 }
 0x5c8   : > { %p2704_p0 = pnand %p2703_p4, %p2697_p11 }
 0x5ca   : > { %2707 = shalt.err (!%p2704_p0)
}
 0x5cb   : > { %s2807_s18 = smov 128   ;;  %s2808_s27 = smov 8  }
 0x5cc   : > { %2439 = dma.vmem_to_hbm [thread:$0]  (%p3009_p5), %s3315_s4, 256, %s3321_s0, %s2029_s13, %s2807_s18, %s2807_s18, %s2808_s27  }
 0x5cd   : > { %s2263_s10 = sshll.u32 %s2876_s9, 7  ;;  %s407_s14 = scalar_lea.vmem [#allocation11], %s2223_s17 }
 0x5ce   : > { %s2042_s16 = sshll.u32 %s407_s14, 4  ;;  %s3355_s19 = scalar_lea.hbm %s3407_s7, %s2263_s10  ;;  %s3357_s16 = int_to_ptr.vmem [resolvable:$true] %s2042_s16 }
 0x5cf   : > { %s2024_s9 = scalar_lea.sflag [#allocation4], %s3099_s24  ;;  %s2708_s17 = scalar_lea.vmem %s3357_s16, 128 }
 0x5d0   : > { %p2709_p8 = scmp.ne.s32.totalorder %s3357_s16, %s2708_s17  ;;  %s2809_s4 = smov [#allocation11]  }
 0x5d1   : > { %s2712_s0 = sshll.u32 %s2809_s4, 4  ;;  %s2713_s0 = int_to_ptr.vmem [resolvable:$false] %s2712_s0 }
 0x5d2   : > { %p2710_p6 = pnand %p2709_p8, %p3009_p5  ;;  %s2714_s13 = scalar_lea.vmem %s2713_s0, 256 }
 0x5d3   : > { %p2715_p3 = scmp.lt.s32.totalorder %s3357_s16, %s2713_s0  ;;  %p2716_p9 = scmp.lt.s32.totalorder %s2714_s13, %s2708_s17 }
 0x5d4   : > { %p2711_p10 = pneg %p2710_p6 }
 0x5d5   : > { %p2717_p13 = por %p2716_p9, %p2715_p3 }
 0x5d7   : > { %p2718_p11 = pnand %p2717_p13, %p2711_p10 }
 0x691   : > { %v1942_v11 = vpop.f32.mrb[8].mxu1  ;;  %v2015_v12 = vpop.f32.mrb[8].mxu0 }
 0x692   : > { %v2019_v13 = vsel %vm418_vm0, %v1942_v11, 0.0  ;;  %v2020_v14 = vsel %vm418_vm0, %v2015_v12, 0.0  ;;  %v2380_v18 = vpop.f32.mrb[9].mxu1  ;;  %v2387_v20 = vpop.f32.mrb[9].mxu0 }
 0x693   : > { %v2021_v22 = vadd.f32 %v2020_v14, %v2019_v13 }
 0x695   : > { %2022 = vst.msk [vmem:[%s407_s14] sm:$0xff] %vm418_vm0, %v2021_v22 }
 0x696   : > { %2721 = shalt.err (!%p2718_p11)
}
 0x697   : > { %s2722_s24 = scalar_lea.hbm %s3355_s19, 128  ;;  %s2726_s21 = scalar_lea.hbm %s3407_s7, 256 }
 0x698   : > { %p2723_p7 = scmp.ne.s32.totalorder %s3355_s19, %s2722_s24  ;;  %p2727_p2 = scmp.lt.u32.totalorder %s3355_s19, %s3407_s7 }
 0x699   : > { %p2728_p4 = scmp.lt.u32.totalorder %s2726_s21, %s2722_s24  ;;  %p2730_p8 = scmp.lt.u32.totalorder %s2722_s24, %s3355_s19 }
 0x69a   : > { %p2724_p12 = pnand %p2723_p7, %p3009_p5 }
 0x69b   : > { %p2729_p0 = por %p2728_p4, %p2727_p2 }
 0x69c   : > { %p2725_p1 = pneg %p2724_p12 }
 0x69d   : > { %p2731_p6 = por %p2730_p8, %p2729_p0 }
 0x69f   : > { %p2732_p10 = pnand %p2731_p6, %p2725_p1 }
 0x6a1   : > { %2735 = shalt.err (!%p2732_p10)
}
 0x6a2   : > { %2438 = dma.vmem_to_hbm [thread:$0]  (%p3009_p5), %s3357_s16, 128, %s3355_s19, %s2024_s9  }
 0x6a3 PF: > { %s3438_s27 = sld [smem:[#allocation20_spill]]  ;;  %s3439_s10 = sld [smem:[#allocation21_spill]] }
 0x6a4   : > { %p3441_p9 = scmp.ge.s32.totalorder %s2790_s30, 2 }
 0x6a9   : > { %s2070_s14 = sand.u32 1, %s3438_s27   ;;  %p3440_p3 = scmp.ne.s32.totalorder %s3439_s10, 0 }
 0x6aa   : > { %s2071_s11 = scalar_lea.sflag [#allocation4], %s2070_s14 }
 0x6ab   : > { %p2460_p13 = pnand %p3441_p9, %p3440_p3 }
 0x6ad   : > { %2769 = dma.done.wait (!%p2460_p13), %s2071_s11, 128  }
 0x6ae   : > { %2771 = vsyncadd (!%p2460_p13), %s2071_s11, 4294967168  ;;  %s2080_s12 = scalar_lea.sflag [#allocation13], %s2070_s14 }
 0x6af   : > { %2773 = dma.done.wait (!%p2460_p13), %s2080_s12, 256  }
 0x6b0   : > { %2775 = vsyncadd (!%p2460_p13), %s2080_s12, 4294967040  ;;  %p29_p5 = scmp.ge.s32.totalorder %s2995_s26, 4   ;;  %s3442_s27 = smov %s2782_s28 }
 0x6b1   : > { %s3443_s28 = smov %s2786_s29  ;;  %s3444_s29 = smov %s3005_s22 }
 0x6b2   : > { %s3445_s30 = smov %s2995_s26  ;;  %31 = sbr.rel (!%p29_p5) target bundleno = 13 (0xd), region = 135 }
 0x6b9   :  { %2085 = vsyncpa [#allocation3], 1 }
 0x6ba   :  { %2087 = vsyncpa [#allocation3 + $0x1], 1 }
 0x6bb   :  { %2088 = vsyncpa [#allocation6], 1 }
 0x6bc   :  { %2090 = vsyncpa [#allocation6 + $0x1], 1 }
 0x6bd   :  { %2091 = vsyncpa [#allocation9], 1 }
 0x6be   :  { %2092 = vsyncpa [#allocation4], 1 }
 0x6bf   :  { %2094 = vsyncpa [#allocation4 + $0x1], 1 }
 0x6c0   :  { %2095 = vsyncpa [#allocation13], 1 }
 0x6c1   :  { %2097 = vsyncpa [#allocation13 + $0x1], 1 }

</bundles_post_ra>
